<compile_context>
chip_gen: v7x
topology: tpu7x:2x2x1
jax: 0.10.0
libtpu: 0.0.40
codegen_flags: <defaults>
</compile_context>

<pallas_src>
import functools

import jax
import jax.numpy as jnp
from jax.experimental import pallas as pl
from jax.experimental.pallas import tpu as pltpu

OUT_PAD = 128  # lane-dense output slab width (policy lanes 0..out-1, value lane `out`)


# ---------------------------------------------------------------------------
# Kernel
# ---------------------------------------------------------------------------
def _oracle_kernel(x_ref, w1_ref, w2_ref, out_ref):
    # x_ref : (TB, D_in)
    # w1_ref: (D_in + 1, 2H)   rows 0..D_in-1 = [W1p | W1v], row D_in = [b1p | b1v]
    # w2_ref: (2H + 1, 128)    block-diag [W2p | W2v] with bias row 2H
    # out_ref: (TB, 128)       f32 or bf16 slab (accumulation is always f32)
    d_in = x_ref.shape[-1]
    h2 = w2_ref.shape[0] - 1  # 2 * hidden

    x = x_ref[...]

    # Fused first layer (policy + value hidden in one MXU pass), bias folded in.
    h = jnp.dot(x, w1_ref[pl.ds(0, d_in), :], preferred_element_type=jnp.float32)
    h = h + w1_ref[pl.ds(d_in, 1), :]
    h = jnp.maximum(h, 0.0)                       # (TB, 2H)

    # Fused block-diagonal second layer (policy head + value head), bias folded in.
    out = jnp.dot(h, w2_ref[pl.ds(0, h2), :], preferred_element_type=jnp.float32)
    out = out + w2_ref[pl.ds(h2, 1), :]
    out_ref[...] = out.astype(out_ref.dtype)      # (TB, 128) lane-dense store


# ---------------------------------------------------------------------------
# Tile selection
# ---------------------------------------------------------------------------
def _pick_tile_rows(B):
    """Rows per grid step.

    - B <= 1024: one grid step (a grid is a sequential loop on 1-TC parts, so
      splitting a mem-bound op only adds per-step overhead).
    - Large B: keep >= 2 steps (so the "parallel" batch axis can shard across
      v7x's two TensorCores), capped at 2048 rows/step.  At TB=2048 the
      double-buffered VMEM footprint is only ~2.5 MiB (obs 2x128 KiB, slab
      2x1 MiB, weights ~75 KiB) -- far below every chip's VMEM budget.
    """
    if B <= 1024:
        return B
    half = ((B + 1) // 2 + 7) // 8 * 8   # ceil(B/2), rounded up to a sublane multiple
    return min(2048, half)


# ---------------------------------------------------------------------------
# Wrappers
# ---------------------------------------------------------------------------
def oracle_slab(obs, packed, *, out_dtype=jnp.float32, tile_rows=None):
    """Run the fused kernel; return the lane-dense (B, OUT_PAD) slab.

    Lane layout: lanes [0, out_size) = policy logits, lane out_size = value,
    remaining lanes are zero.  `tile_rows` overrides the batch tile (testing).
    """
    w1, w2 = packed["w1"], packed["w2"]
    B, D_in = obs.shape
    assert w1.shape[0] == D_in + 1
    H2 = w2.shape[0] - 1
    assert w2.shape[1] == OUT_PAD

    TB = tile_rows if tile_rows is not None else _pick_tile_rows(B)
    nb = pl.cdiv(B, TB)

    return pl.pallas_call(
        _oracle_kernel,
        out_shape=jax.ShapeDtypeStruct((B, OUT_PAD), out_dtype),
        grid=(nb,),
        in_specs=[
            pl.BlockSpec((TB, D_in), lambda i: (i, 0)),          # obs tile
            pl.BlockSpec((D_in + 1, H2), lambda i: (0, 0)),      # packed W1 (+bias row)
            pl.BlockSpec((H2 + 1, OUT_PAD), lambda i: (0, 0)),   # packed W2 (+bias row)
        ],
        out_specs=pl.BlockSpec((TB, OUT_PAD), lambda i: (i, 0)),
        compiler_params=pltpu.CompilerParams(
            dimension_semantics=("parallel",)),
    )(obs, w1, w2)


def oracle_forward(obs, packed, *, out_size, out_dtype=jnp.float32, tile_rows=None):
    """Same semantics as Oracle.forward: (policy (B, out_size), value (B, 1)).

    The two slices are views that fuse with downstream ops under jit; for the
    tightest hot path, consume `oracle_slab()` directly and index the slab.
    """
    assert out_size + 1 <= OUT_PAD
    slab = oracle_slab(obs, packed, out_dtype=out_dtype, tile_rows=tile_rows)
    policy = slab[:, :out_size]
    value = slab[:, out_size:out_size + 1]
    return policy, value


# ---------------------------------------------------------------------------
# Parameter construction / packing
# ---------------------------------------------------------------------------
def init_params(key, input_size, output_size=64, hidden=32, bias_std=0.0):
    """kaiming_normal (fan_in, relu) weights; biases zero by default (matches
    Oracle.init_weights). bias_std > 0 only used to exercise the bias path in
    the numerical check."""
    k1, k2, k3, k4, k5, k6, k7, k8 = jax.random.split(key, 8)

    def kaiming(k, fan_in, fan_out):
        std = jnp.sqrt(2.0 / fan_in)
        # stored as (in, out) = PyTorch (out, in) transposed
        return jax.random.normal(k, (fan_in, fan_out), dtype=jnp.float32) * std

    def bias(k, n):
        if bias_std == 0.0:
            return jnp.zeros((n,), jnp.float32)
        return jax.random.normal(k, (n,), dtype=jnp.float32) * bias_std

    return {
        "w1p": kaiming(k1, input_size, hidden), "b1p": bias(k5, hidden),
        "w2p": kaiming(k2, hidden, output_size), "b2p": bias(k6, output_size),
        "w1v": kaiming(k3, input_size, hidden), "b1v": bias(k7, hidden),
        "w2v": kaiming(k4, hidden, 1), "b2v": bias(k8, 1),
    }


def pack_params(raw, out_size):
    """Pack the 8 raw arrays into 2 HBM arrays (done once, off the hot path)."""
    w1p, w1v = raw["w1p"], raw["w1v"]
    w2p, w2v = raw["w2p"], raw["w2v"]
    d_in, h = w1p.shape
    assert out_size + 1 <= OUT_PAD

    # [W1p | W1v] with bias row appended.
    w1 = jnp.zeros((d_in + 1, 2 * h), jnp.float32)
    w1 = w1.at[:d_in, :h].set(w1p)
    w1 = w1.at[:d_in, h:].set(w1v)
    w1 = w1.at[d_in, :h].set(raw["b1p"])
    w1 = w1.at[d_in, h:].set(raw["b1v"])

    # Block-diagonal second layer, lane-padded to 128, bias row appended.
    # Off-diagonal blocks are exactly zero so heads cannot cross-contaminate.
    w2 = jnp.zeros((2 * h + 1, OUT_PAD), jnp.float32)
    w2 = w2.at[:h, :out_size].set(w2p)
    w2 = w2.at[h:2 * h, out_size:out_size + 1].set(w2v)
    w2 = w2.at[2 * h, :out_size].set(raw["b2p"])
    w2 = w2.at[2 * h, out_size:out_size + 1].set(raw["b2v"])

    return {"w1": w1, "w2": w2}


def ref_forward(obs, raw):
    h_p = jnp.maximum(obs @ raw["w1p"] + raw["b1p"], 0.0)
    pol = h_p @ raw["w2p"] + raw["b2p"]
    h_v = jnp.maximum(obs @ raw["w1v"] + raw["b1v"], 0.0)
    val = h_v @ raw["w2v"] + raw["b2v"]
    return pol, val


if __name__ == "__main__":
    key = jax.random.PRNGKey(0)
    k_obs, k_param, k_obs2 = jax.random.split(key, 3)

    input_size = 16       # observation_space.shape[0]
    output_size = 64
    hidden = 32

    # bias_std=0.05 only so the folded-bias path is actually checked numerically;
    # Oracle.init_weights itself uses zero biases (bias_std=0.0 default).
    raw = init_params(k_param, input_size, output_size, hidden, bias_std=0.05)
    packed = pack_params(raw, output_size)

    # --- 1) Small batch, single grid step, f32 slab -------------------------
    batch = 8
    obs = jax.random.normal(k_obs, (batch, input_size), dtype=jnp.float32)
    fwd = jax.jit(functools.partial(oracle_forward, out_size=output_size))
    policy, value = fwd(obs, packed)
    jax.block_until_ready((policy, value))
    pol_ref, val_ref = ref_forward(obs, raw)
    assert policy.shape == (batch, output_size)
    assert value.shape == (batch, 1)
    assert jnp.allclose(policy, pol_ref, atol=1e-5)
    assert jnp.allclose(value, val_ref, atol=1e-5)

    # --- 2) Ragged multi-step path (B > TB and B % TB != 0) -----------------
    batch2 = 200
    obs2 = jax.random.normal(k_obs2, (batch2, input_size), dtype=jnp.float32)
    policy2, value2 = oracle_forward(obs2, packed, out_size=output_size,
                                     tile_rows=128)   # grid=(2,), last block masked
    jax.block_until_ready((policy2, value2))
    pol_ref2, val_ref2 = ref_forward(obs2, raw)
    assert policy2.shape == (batch2, output_size)
    assert value2.shape == (batch2, 1)
    assert jnp.allclose(policy2, pol_ref2, atol=1e-5)
    assert jnp.allclose(value2, val_ref2, atol=1e-5)

    # --- 3) Optional bf16 output slab (f32 accumulation, packed store) ------
    batch3 = 16
    obs3 = jnp.concatenate([obs, obs], axis=0)
    pol_bf16, val_bf16 = oracle_forward(obs3, packed, out_size=output_size,
                                        out_dtype=jnp.bfloat16)
    jax.block_until_ready((pol_bf16, val_bf16))
    pol_ref3 = jnp.concatenate([pol_ref, pol_ref], axis=0)
    val_ref3 = jnp.concatenate([val_ref, val_ref], axis=0)
    assert pol_bf16.dtype == jnp.bfloat16 and pol_bf16.shape == (batch3, output_size)
    assert jnp.allclose(pol_bf16.astype(jnp.float32), pol_ref3, atol=5e-2, rtol=5e-2)
    assert jnp.allclose(val_bf16.astype(jnp.float32), val_ref3, atol=5e-2, rtol=5e-2)

    print("KERNEL_OK")
</pallas_src>

<mosaic_0001>
module attributes {stable_mosaic.version = 11 : i64} {
  func.func @_oracle_kernel(%arg0: i32, %arg1: memref<8x16xf32, #tpu.memory_space<vmem>>, %arg2: memref<17x64xf32, #tpu.memory_space<vmem>>, %arg3: memref<65x128xf32, #tpu.memory_space<vmem>>, %arg4: memref<8x128xf32, #tpu.memory_space<vmem>>) attributes {dimension_semantics = [#tpu.dimension_semantics<parallel>], iteration_bounds = array<i64: 1>, scalar_prefetch = 0 : i64, scratch_operands = 0 : i64, tpu.core_type = #tpu.core_type<tc>, window_params = [{transform_indices = @transform_0, window_bounds = array<i64: 8, 16>}, {pipeline_mode = #tpu.pipeline_mode<synchronous>, transform_indices = @transform_1, window_bounds = array<i64: 17, 64>}, {pipeline_mode = #tpu.pipeline_mode<synchronous>, transform_indices = @transform_2, window_bounds = array<i64: 65, 128>}, {transform_indices = @transform_3, window_bounds = array<i64: 8, 128>}]} {
    %c0 = arith.constant 0 : index
    %c0_0 = arith.constant 0 : index
    %0 = vector.load %arg1[%c0, %c0_0] : memref<8x16xf32, #tpu.memory_space<vmem>>, vector<8x16xf32>
    %c0_1 = arith.constant 0 : index
    %c0_2 = arith.constant 0 : index
    %1 = vector.load %arg2[%c0_1, %c0_2] : memref<17x64xf32, #tpu.memory_space<vmem>>, vector<16x64xf32>
    %cst = arith.constant dense<0.000000e+00> : vector<8x64xf32>
    %2 = tpu.matmul %0, %1, %cst {dimension_numbers = #tpu.dot_dimension_numbers<[1], [0], [0], [1], [0, 0, 1, 1], [], []>} : vector<8x16xf32>, vector<16x64xf32>, vector<8x64xf32> -> vector<8x64xf32>
    %c16 = arith.constant 16 : index
    %c0_3 = arith.constant 0 : index
    %3 = vector.load %arg2[%c16, %c0_3] : memref<17x64xf32, #tpu.memory_space<vmem>>, vector<1x64xf32>
    %4 = vector.broadcast %3 : vector<1x64xf32> to vector<8x64xf32>
    %5 = arith.addf %2, %4 : vector<8x64xf32>
    %cst_4 = arith.constant 0.000000e+00 : f32
    %6 = vector.broadcast %cst_4 : f32 to vector<8x64xf32>
    %7 = arith.maximumf %5, %6 : vector<8x64xf32>
    %c0_5 = arith.constant 0 : index
    %c0_6 = arith.constant 0 : index
    %8 = vector.load %arg3[%c0_5, %c0_6] : memref<65x128xf32, #tpu.memory_space<vmem>>, vector<64x128xf32>
    %cst_7 = arith.constant dense<0.000000e+00> : vector<8x128xf32>
    %9 = tpu.matmul %7, %8, %cst_7 {dimension_numbers = #tpu.dot_dimension_numbers<[1], [0], [0], [1], [0, 0, 1, 1], [], []>} : vector<8x64xf32>, vector<64x128xf32>, vector<8x128xf32> -> vector<8x128xf32>
    %c64 = arith.constant 64 : index
    %c0_8 = arith.constant 0 : index
    %10 = vector.load %arg3[%c64, %c0_8] : memref<65x128xf32, #tpu.memory_space<vmem>>, vector<1x128xf32>
    %11 = vector.broadcast %10 : vector<1x128xf32> to vector<8x128xf32>
    %12 = arith.addf %9, %11 : vector<8x128xf32>
    %c0_9 = arith.constant 0 : index
    %c0_10 = arith.constant 0 : index
    %13 = vector.load %arg4[%c0_9, %c0_10] : memref<8x128xf32, #tpu.memory_space<vmem>>, vector<8x128xf32>
    tpu.vector_store %arg4[%c0_9, %c0_10], %12 {strides = array<i32>} : memref<8x128xf32, #tpu.memory_space<vmem>>, vector<8x128xf32>,
    return
  }
  func.func @transform_0(%arg0: i32) -> (i32, i32) {
    %c0_i32 = arith.constant 0 : i32
    %c0_i32_0 = arith.constant 0 : i32
    return %arg0, %c0_i32 : i32, i32
  }
  func.func @transform_1(%arg0: i32) -> (i32, i32) {
    %c0_i32 = arith.constant 0 : i32
    %c0_i32_0 = arith.constant 0 : i32
    %c0_i32_1 = arith.constant 0 : i32
    return %c0_i32, %c0_i32_0 : i32, i32
  }
  func.func @transform_2(%arg0: i32) -> (i32, i32) {
    %c0_i32 = arith.constant 0 : i32
    %c0_i32_0 = arith.constant 0 : i32
    %c0_i32_1 = arith.constant 0 : i32
    return %c0_i32, %c0_i32_0 : i32, i32
  }
  func.func @transform_3(%arg0: i32) -> (i32, i32) {
    %c0_i32 = arith.constant 0 : i32
    %c0_i32_0 = arith.constant 0 : i32
    return %arg0, %c0_i32 : i32, i32
  }
}

</mosaic_0001>

<bundles_post_ra>
// kernel: oracle_forward.1
= control target key start
LH: loop header
LB: loop body
LE: loop exit
PB: predicated region body
PF: predicated region fallthrough
CT: control target
= control target key end

     0   :  { %8 = vsyncpa [#allocation3], 0  ;;  %s438_s0 = inlined_call_operand.hbm [shape: f32[8,16], index: 0, kind: input, shape index: {}]   ;;  %s439_s1 = inlined_call_operand.hbm [shape: f32[17,64], index: 1, kind: input, shape index: {}]   ;;  %s440_s2 = inlined_call_operand.hbm [shape: f32[65,128], index: 2, kind: input, shape index: {}]   ;;  %s441_s3 = inlined_call_operand.vmem [shape: f32[8,128], index: 3, kind: output, shape index: {}]  }
   0x1   :  { %9 = vsyncpa [#allocation5], 0  ;;  %s365_s12 = smov [#allocation4]   ;;  %s295_s16 = scalar_lea.hbm %s439_s1, 384 }
   0x2   :  { %s25_s13 = sshll.u32 %s365_s12, 4  ;;  %p296_p0 = scmp.ne.s32.totalorder %s439_s1, %s295_s16  ;;  %s26_s13 = int_to_ptr.vmem [resolvable:$true] %s25_s13 }
   0x3   :  { %p299_p1 = scmp.lt.u32.totalorder %s295_s16, %s439_s1 }
   0x5   :  { %p301_p2 = pnand %p299_p1, %p296_p0 }
   0x7   :  { %304 = shalt.err (!%p301_p2)
}
   0x8   :  { %s305_s21 = scalar_lea.vmem %s26_s13, 384  ;;  %p310_p4 = scmp.lt.s32.totalorder %s26_s13, %s26_s13 }
   0x9   :  { %p306_p3 = scmp.ne.s32.totalorder %s26_s13, %s305_s21  ;;  %p311_p5 = scmp.lt.s32.totalorder %s305_s21, %s305_s21 }
   0xb   :  { %p312_p6 = por %p311_p5, %p310_p4 }
   0xd   :  { %p313_p7 = pnand %p312_p6, %p306_p3 }
   0xf   :  { %316 = shalt.err (!%p313_p7)
}
  0x10   :  { %s366_s22 = smov 128   ;;  %s367_s23 = smov 8  }
  0x11   :  { %31 = dma.hbm_to_vmem [thread:$0]  %s439_s1, 384, %s26_s13, [#allocation5], %s366_s22, %s366_s22, %s367_s23  }
  0x12   :  { %s368_s26 = smov [#allocation2]   ;;  %s369_s28 = smov [#allocation6]  }
  0x13   :  { %s16_s27 = sshll.u32 %s368_s26, 4  ;;  %s37_s29 = sshll.u32 %s369_s28, 4  ;;  %s17_s27 = int_to_ptr.vmem [resolvable:$true] %s16_s27  ;;  %s38_s29 = int_to_ptr.vmem [resolvable:$true] %s37_s29 }
  0x14   :  { %s317_s5 = scalar_lea.hbm %s438_s0, 128 }
  0x15   :  { %p318_p8 = scmp.ne.s32.totalorder %s438_s0, %s317_s5  ;;  %p321_p9 = scmp.lt.u32.totalorder %s317_s5, %s438_s0 }
  0x17   :  { %p323_p10 = pnand %p321_p9, %p318_p8 }
  0x19   :  { %326 = shalt.err (!%p323_p10)
}
  0x1a   :  { %s327_s1 = scalar_lea.vmem %s17_s27, 128  ;;  %p332_p12 = scmp.lt.s32.totalorder %s17_s27, %s17_s27 }
  0x1b   :  { %p328_p11 = scmp.ne.s32.totalorder %s17_s27, %s327_s1  ;;  %p333_p13 = scmp.lt.s32.totalorder %s327_s1, %s327_s1 }
  0x1d   :  { %p334_p0 = por %p333_p13, %p332_p12 }
  0x1f   :  { %p335_p1 = pnand %p334_p0, %p328_p11 }
  0x21   :  { %338 = shalt.err (!%p335_p1)
}
  0x22   :  { %19 = dma.hbm_to_vmem [thread:$0]  %s438_s0, 128, %s17_s27, [#allocation3]  }
  0x23   :  { %s339_s14 = scalar_lea.hbm %s440_s2, 1152 }
  0x24   :  { %p340_p2 = scmp.ne.s32.totalorder %s440_s2, %s339_s14  ;;  %p343_p3 = scmp.lt.u32.totalorder %s339_s14, %s440_s2 }
  0x26   :  { %p345_p4 = pnand %p343_p3, %p340_p2 }
  0x28   :  { %348 = shalt.err (!%p345_p4)
}
  0x29   :  { %s349_s19 = scalar_lea.vmem %s38_s29, 1152  ;;  %p354_p6 = scmp.lt.s32.totalorder %s38_s29, %s38_s29 }
  0x2a   :  { %p350_p5 = scmp.ne.s32.totalorder %s38_s29, %s349_s19  ;;  %p355_p7 = scmp.lt.s32.totalorder %s349_s19, %s349_s19 }
  0x2c   :  { %p356_p8 = por %p355_p7, %p354_p6 }
  0x2e   :  { %p357_p9 = pnand %p356_p8, %p350_p5 }
  0x30   :  { %360 = shalt.err (!%p357_p9)
}
  0x31   :  { %43 = dma.hbm_to_vmem [thread:$0]  %s440_s2, 1152, %s38_s29, [#allocation5], %s366_s22, %s366_s22, %s367_s23  }
  0x32   :  { %361 = dma.done.wait [#allocation3], 128  }
  0x33   :  { %362 = vsyncadd [#allocation3], 4294967168 }
  0x34   :  { %363 = dma.done.wait [#allocation5], 1536  }
  0x35   :  { %364 = vsyncadd [#allocation5], 4294965760  ;;  %v370_v0 = vmov 0.0|0.0   ;;  %vm371_vm0 = vmmov 0   ;;  %v372_v1 = vmov 0.0   ;;  %v54_v2 = vld [vmem:[#allocation4] sm:$0xff] }
  0x36   :  { %272 = vmatprep.subr.bf16.mxu0 %v370_v0  ;;  %250 = vmatprep.mubr.msk.f32.mxu0 %vm371_vm0, %v372_v1  ;;  %v55_v3 = vld [vmem:[#allocation4 + $0x8] sm:$0xff]  ;;  %v136_v5 = vld [vmem:[#allocation6] sm:$0xff]  ;;  %v137_v6 = vld [vmem:[#allocation6 + $0x8] sm:$0xff]  ;;  %vm61_vm1 = vcmask 130048   ;;  %vm149_vm2 = vcmask 523264  }
  0x37   :  { %275 = vmatprep.subr.bf16.mxu1 %v370_v0  ;;  %269 = vmatprep.mubr.msk.f32.mxu1 %vm371_vm0, %v372_v1  ;;  %v273_v4 = vpack.c.bf16 %v55_v3, %v54_v2  ;;  %v138_v7 = vld [vmem:[#allocation6 + $0x10] sm:$0xff]  ;;  %v276_v8 = vpack.c.bf16 %v137_v6, %v136_v5  ;;  %v139_v9 = vld [vmem:[#allocation6 + $0x18] sm:$0xff]  ;;  %v53_v10 = vld [vmem:[#allocation2] sm:$0xff] }
  0x38   :  { %v279_v11 = vpack.c.bf16 %v139_v9, %v138_v7  ;;  %v140_v12 = vld [vmem:[#allocation6 + $0x20] sm:$0xff]  ;;  %v141_v13 = vld [vmem:[#allocation6 + $0x28] sm:$0xff]  ;;  %v142_v15 = vld [vmem:[#allocation6 + $0x30] sm:$0xff] }
  0x39   :  { %274 = vmatpush3.bf16.msra.mxu0 %v273_v4  ;;  %277 = vmatpush3.bf16.msra.mxu1 %v276_v8  ;;  %v282_v14 = vpack.c.bf16 %v141_v13, %v140_v12  ;;  %v143_v16 = vld [vmem:[#allocation6 + $0x38] sm:$0xff]  ;;  %v232_v23 = vld [vmem:[#allocation6 + $0x40] ss:$0 sm:$0xff] }
  0x3a   :  { %278 = vmatprep.subr.bf16.mxu1 %v370_v0  ;;  %v285_v17 = vpack.c.bf16 %v143_v16, %v142_v15  ;;  %v230_v18 = vld [vmem:[#allocation4 + $0x10] ss:$0 sm:$0xff] }
  0x3c   :  { %251 = vmatmul.mubr.msk.f32.vlgmr.msra.gmra.mrb[0].mxu0 %vm61_vm1, %v53_v10 }
  0x3d   :  { %280 = vmatpush3.bf16.msra.mxu1 %v279_v11 }
  0x3e   :  { %281 = vmatprep.subr.bf16.mxu1 %v370_v0 }
  0x41   :  { %283 = vmatpush3.bf16.msra.mxu1 %v282_v14 }
  0x42   :  { %284 = vmatprep.subr.bf16.mxu1 %v370_v0 }
  0x45   :  { %286 = vmatpush3.bf16.msra.mxu1 %v285_v17 }
 0x10f   :  { %v131_v19 = vpop.f32.mrb[0].mxu0 }
 0x110   :  { %v132_v20 = vadd.f32 %v230_v18, %v131_v19  ;;  %v252_v21 = vpop.f32.mrb[1].mxu0 }
 0x112   :  { %v135_v22 = vmax.f32 %v132_v20, 0.0 }
 0x114   :  { %270 = vmatmul.mubr.msk.f32.vlgmr.msra.gmra.mrb[0].mxu1 %vm149_vm2, %v135_v22 }
 0x1e7   :  { %v219_v24 = vpop.f32.mrb[0].mxu1 }
 0x1e8   :  { %v220_v25 = vadd.f32 %v232_v23, %v219_v24  ;;  %v271_v26 = vpop.f32.mrb[1].mxu1 }
 0x1ea   :  { %223 = vst [vmem:[%s441_s3] sm:$0xff] %v220_v25 }
 0x1eb   :  { %228 = vsyncpa [#allocation3], 1 }
 0x1ec   :  { %229 = vsyncpa [#allocation5], 1 }

</bundles_post_ra>
